<compile_context>
chip_gen: v7x
topology: tpu7x:2x2x1
jax: 0.10.0
libtpu: 0.0.40
codegen_flags: <defaults>
</compile_context>

<pallas_src>
import jax
import jax.numpy as jnp
import numpy as np
from jax.experimental import pallas as pl
from jax.experimental.pallas import tpu as pltpu


def lstm_hc_kernel(x_ref, wih_ref, whh_ref, b_ref, wtag_ref, btag_ref,
                   out_ref, h_sc, c_sc, hs_sc, gx_sc):
    TC, B, E = x_ref.shape          # timestep chunk, batch block, emb dim
    H = whh_ref.shape[0]            # hidden dim
    TP = wtag_ref.shape[1]          # lane-dense (padded) tagset size
    wdt = wih_ref.dtype             # matmul operand dtype (f32 or bf16)

    @pl.when(pl.program_id(1) == 0)
    def _():
        h_sc[...] = jnp.zeros_like(h_sc)
        c_sc[...] = jnp.zeros_like(c_sc)

    # ---- hoisted, non-recurrent work (once per chunk) --------------------
    # others = x[:, :, :20]; text = sigmoid(x[:, :, 20:]); positions are
    # preserved by the cat, so a lane-select is equivalent.
    xp = x_ref[...]                                               # (TC, B, E)
    feat_idx = jax.lax.broadcasted_iota(jnp.int32, xp.shape, 2)
    xp = jnp.where(feat_idx < 20, xp, jax.nn.sigmoid(xp))

    # Input projection + bias for the whole chunk, one MXU call, spilled to a
    # flat VMEM scratch so the unrolled recurrence only does one vld per step.
    gx_sc[...] = (
        jnp.dot(xp.reshape(TC * B, E).astype(wdt), wih_ref[...],
                preferred_element_type=jnp.float32)
        + b_ref[...])                                             # (TC*B, 4H)

    # Hoisted gate masks (PyTorch gate order i,f,g,o).
    # sigmoid(x) = 0.5 * (1 + tanh(x/2))  ->  one EUP push per step.
    gate_idx = jax.lax.broadcasted_iota(jnp.int32, (B, 4 * H), 1)
    is_g = (gate_idx >= 2 * H) & (gate_idx < 3 * H)
    pre_scale = jnp.where(is_g, 1.0, 0.5).astype(jnp.float32)     # (B, 4H)
    post_bias = jnp.where(is_g, 0.0, 0.5).astype(jnp.float32)     # (B, 4H)

    whh = whh_ref[...]              # (H, 4H) hoisted into vregs once

    # ---- sequential recurrence over the chunk (fully unrolled) -----------
    h = h_sc[...]
    c = c_sc[...]
    for t in range(TC):             # static trip count -> fully unrolled
        gates = gx_sc[pl.ds(t * B, B), :] + jnp.dot(
            h.astype(wdt), whh, preferred_element_type=jnp.float32)  # (B,4H)
        th = jnp.tanh(gates * pre_scale)           # single EUP push
        acts = th * pre_scale + post_bias          # tanh on g, sigmoid elsewhere
        i = acts[:, 0 * H:1 * H]
        f = acts[:, 1 * H:2 * H]
        g = acts[:, 2 * H:3 * H]
        o = acts[:, 3 * H:4 * H]
        c = f * c + i * g
        h = o * jnp.tanh(c)
        hs_sc[pl.ds(t * B, B), :] = h              # store in final flat layout
    h_sc[...] = h
    c_sc[...] = c

    # ---- hidden2tag for the whole chunk: one matmul, one dense store ------
    tags = (jnp.dot(hs_sc[...].astype(wdt), wtag_ref[...],
                    preferred_element_type=jnp.float32)
            + btag_ref[...])                                      # (TC*B, TP)
    out_ref[...] = tags.reshape(TC, B, TP).astype(out_ref.dtype)


def lstm_hc_forward(x, w_ih, w_hh, b_ih, b_hh, w_tag, b_tag, *,
                    t_chunk=64, b_chunk=None, mm_dtype=jnp.float32):
    """x: (S, B, E) float32.  Weights in PyTorch shapes:
       w_ih: (4H, E), w_hh: (4H, H), b_ih/b_hh: (4H,), w_tag: (T, H), b_tag: (T,)."""
    S, B, E = x.shape
    H = w_ih.shape[0] // 4
    T = w_tag.shape[0]
    assert E > 20, "LSTMHC assumes embedding_dim > 20 for the [:, :, 20:] sigmoid"

    # Pad batch to a full 8-sublane tile, the tag dim to a lane-dense multiple
    # of 128, and the sequence to a multiple of the timestep chunk.  All pads
    # are zeros and sliced off below.
    B_pad = -(-B // 8) * 8
    T_pad = -(-T // 128) * 128

    if b_chunk is None:
        b_block = B_pad
    else:
        b_block = max(8, (min(b_chunk, B_pad) // 8) * 8)
        while B_pad % b_block:
            b_block -= 8

    t_chunk = max(1, min(t_chunk, S))
    wbytes = jnp.dtype(mm_dtype).itemsize

    def _chunk_vmem_bytes(tc):
        f = 4
        xb = 2 * tc * b_block * E * f                       # x block, 2 bufs
        ob = 2 * tc * b_block * T_pad * f                   # out block, 2 bufs
        wb = 2 * ((E + H) * 4 * H * wbytes + 4 * H * f
                  + H * T_pad * wbytes + T_pad * f)         # weights, 2 bufs
        sc = (2 * b_block * H                               # h, c state
              + tc * b_block * H                            # hs chunk
              + tc * b_block * 4 * H) * f                   # gx chunk
        return xb + ob + wb + sc

    VMEM_BUDGET = 24 * 1024 * 1024          # safe on v7x (64 MiB physical)
    while t_chunk > 1 and _chunk_vmem_bytes(t_chunk) > VMEM_BUDGET:
        t_chunk //= 2
    vmem_limit = int(min(48 * 1024 * 1024,
                         max(16 * 1024 * 1024, 2 * _chunk_vmem_bytes(t_chunk))))

    S_pad = pl.cdiv(S, t_chunk) * t_chunk
    x_p = jnp.pad(x, ((0, S_pad - S), (0, B_pad - B), (0, 0)))

    wih_t = jnp.transpose(w_ih).astype(mm_dtype)                      # (E, 4H)
    whh_t = jnp.transpose(w_hh).astype(mm_dtype)                      # (H, 4H)
    b = (b_ih + b_hh).reshape(1, 4 * H).astype(jnp.float32)           # (1, 4H)
    wtag_t = jnp.pad(jnp.transpose(w_tag),
                     ((0, 0), (0, T_pad - T))).astype(mm_dtype)       # (H, Tp)
    btag = jnp.pad(b_tag, (0, T_pad - T)).reshape(1, T_pad).astype(jnp.float32)

    out = pl.pallas_call(
        lstm_hc_kernel,
        out_shape=jax.ShapeDtypeStruct((S_pad, B_pad, T_pad), jnp.float32),
        grid_spec=pltpu.PrefetchScalarGridSpec(
            num_scalar_prefetch=0,
            grid=(B_pad // b_block, S_pad // t_chunk),
            in_specs=[
                pl.BlockSpec((t_chunk, b_block, E), lambda b, t: (t, b, 0)),
                pl.BlockSpec((E, 4 * H), lambda b, t: (0, 0)),
                pl.BlockSpec((H, 4 * H), lambda b, t: (0, 0)),
                pl.BlockSpec((1, 4 * H), lambda b, t: (0, 0)),
                pl.BlockSpec((H, T_pad), lambda b, t: (0, 0)),
                pl.BlockSpec((1, T_pad), lambda b, t: (0, 0)),
            ],
            out_specs=pl.BlockSpec((t_chunk, b_block, T_pad),
                                   lambda b, t: (t, b, 0)),
            scratch_shapes=[
                pltpu.VMEM((b_block, H), jnp.float32),               # h state
                pltpu.VMEM((b_block, H), jnp.float32),               # c state
                pltpu.VMEM((t_chunk * b_block, H), jnp.float32),     # hs chunk
                pltpu.VMEM((t_chunk * b_block, 4 * H), jnp.float32), # gx chunk
            ],
        ),
        compiler_params=pltpu.CompilerParams(
            dimension_semantics=("parallel", "arbitrary"),
            vmem_limit_bytes=vmem_limit),
    )(x_p, wih_t, whh_t, b, wtag_t, btag)
    return out[:S, :B, :T]


def lstm_hc_reference(x, w_ih, w_hh, b_ih, b_hh, w_tag, b_tag):
    """Pure-JAX reference mirroring the PyTorch forward (eval mode)."""
    S, B, E = x.shape
    H = w_hh.shape[1]
    others = x[:, :, :20]
    text = jax.nn.sigmoid(x[:, :, 20:])
    xp = jnp.concatenate([others, text], axis=2)

    def step(carry, x_t):
        h, c = carry
        gates = x_t @ w_ih.T + b_ih + h @ w_hh.T + b_hh
        i = jax.nn.sigmoid(gates[:, 0 * H:1 * H])
        f = jax.nn.sigmoid(gates[:, 1 * H:2 * H])
        g = jnp.tanh(gates[:, 2 * H:3 * H])
        o = jax.nn.sigmoid(gates[:, 3 * H:4 * H])
        c = f * c + i * g
        h = o * jnp.tanh(c)
        return (h, c), h

    h0 = jnp.zeros((B, H), jnp.float32)
    c0 = jnp.zeros((B, H), jnp.float32)
    _, hs = jax.lax.scan(step, (h0, c0), xp)
    return hs @ w_tag.T + b_tag


if __name__ == "__main__":
    # embedding_dim must exceed 20 so the [:, :, 20:] sigmoid slice is non-empty.
    S, B, E, H, T = 8, 2, 24, 32, 5

    key = jax.random.PRNGKey(0)
    ks = jax.random.split(key, 7)
    scale = 1.0 / np.sqrt(H)
    x = jax.random.normal(ks[0], (S, B, E), dtype=jnp.float32)
    w_ih = jax.random.uniform(ks[1], (4 * H, E), jnp.float32, -scale, scale)
    w_hh = jax.random.uniform(ks[2], (4 * H, H), jnp.float32, -scale, scale)
    b_ih = jax.random.uniform(ks[3], (4 * H,), jnp.float32, -scale, scale)
    b_hh = jax.random.uniform(ks[4], (4 * H,), jnp.float32, -scale, scale)
    w_tag = jax.random.uniform(ks[5], (T, H), jnp.float32, -scale, scale)
    b_tag = jax.random.uniform(ks[6], (T,), jnp.float32, -scale, scale)

    out = lstm_hc_forward(x, w_ih, w_hh, b_ih, b_hh, w_tag, b_tag)
    out = jax.block_until_ready(out)

    ref = jax.block_until_ready(
        lstm_hc_reference(x, w_ih, w_hh, b_ih, b_hh, w_tag, b_tag))
    np.testing.assert_allclose(np.asarray(out), np.asarray(ref),
                               rtol=2e-5, atol=2e-5)
    print("KERNEL_OK")
</pallas_src>

<mosaic_0001>
module attributes {stable_mosaic.version = 11 : i64} {
  func.func @lstm_hc_kernel(%arg0: i32, %arg1: i32, %arg2: memref<8x8x24xf32, #tpu.memory_space<vmem>>, %arg3: memref<24x128xf32, #tpu.memory_space<vmem>>, %arg4: memref<32x128xf32, #tpu.memory_space<vmem>>, %arg5: memref<1x128xf32, #tpu.memory_space<vmem>>, %arg6: memref<32x128xf32, #tpu.memory_space<vmem>>, %arg7: memref<1x128xf32, #tpu.memory_space<vmem>>, %arg8: memref<8x8x128xf32, #tpu.memory_space<vmem>>, %arg9: memref<8x32xf32, #tpu.memory_space<vmem>>, %arg10: memref<8x32xf32, #tpu.memory_space<vmem>>, %arg11: memref<64x32xf32, #tpu.memory_space<vmem>>, %arg12: memref<64x128xf32, #tpu.memory_space<vmem>>) attributes {dimension_semantics = [#tpu.dimension_semantics<parallel>, #tpu.dimension_semantics<arbitrary>], iteration_bounds = array<i64: 1, 1>, scalar_prefetch = 0 : i64, scratch_operands = 4 : i64, tpu.core_type = #tpu.core_type<tc>, window_params = [{transform_indices = @transform_0, window_bounds = array<i64: 8, 8, 24>}, {pipeline_mode = #tpu.pipeline_mode<synchronous>, transform_indices = @transform_1, window_bounds = array<i64: 24, 128>}, {pipeline_mode = #tpu.pipeline_mode<synchronous>, transform_indices = @transform_2, window_bounds = array<i64: 32, 128>}, {pipeline_mode = #tpu.pipeline_mode<synchronous>, transform_indices = @transform_3, window_bounds = array<i64: 1, 128>}, {pipeline_mode = #tpu.pipeline_mode<synchronous>, transform_indices = @transform_4, window_bounds = array<i64: 32, 128>}, {pipeline_mode = #tpu.pipeline_mode<synchronous>, transform_indices = @transform_5, window_bounds = array<i64: 1, 128>}, {transform_indices = @transform_6, window_bounds = array<i64: 8, 8, 128>}]} {
    %c0_i32 = arith.constant 0 : i32
    %0 = arith.cmpi eq, %arg1, %c0_i32 : i32
    %1 = arith.extui %0 : i1 to i32
    %c0_i32_0 = arith.constant 0 : i32
    %2 = arith.cmpi ne, %1, %c0_i32_0 : i32
    scf.if %2 {
      %cst_67 = arith.constant 0.000000e+00 : f32
      %181 = vector.broadcast %cst_67 : f32 to vector<8x32xf32>
      %c0_68 = arith.constant 0 : index
      %c0_69 = arith.constant 0 : index
      %182 = vector.load %arg9[%c0_68, %c0_69] : memref<8x32xf32, #tpu.memory_space<vmem>>, vector<8x32xf32>
      tpu.vector_store %arg9[%c0_68, %c0_69], %181 {strides = array<i32>} : memref<8x32xf32, #tpu.memory_space<vmem>>, vector<8x32xf32>,
      %cst_70 = arith.constant 0.000000e+00 : f32
      %183 = vector.broadcast %cst_70 : f32 to vector<8x32xf32>
      %c0_71 = arith.constant 0 : index
      %c0_72 = arith.constant 0 : index
      %184 = vector.load %arg10[%c0_71, %c0_72] : memref<8x32xf32, #tpu.memory_space<vmem>>, vector<8x32xf32>
      tpu.vector_store %arg10[%c0_71, %c0_72], %183 {strides = array<i32>} : memref<8x32xf32, #tpu.memory_space<vmem>>, vector<8x32xf32>,
    } else {
    }
    %c0 = arith.constant 0 : index
    %c0_1 = arith.constant 0 : index
    %c0_2 = arith.constant 0 : index
    %3 = vector.load %arg2[%c0, %c0_1, %c0_2] : memref<8x8x24xf32, #tpu.memory_space<vmem>>, vector<8x8x24xf32>
    %4 = tpu.iota {dimensions = array<i32: 2>} : vector<8x8x24xi32>
    %c20_i32 = arith.constant 20 : i32
    %5 = vector.broadcast %c20_i32 : i32 to vector<8x8x24xi32>
    %6 = arith.cmpi slt, %4, %5 : vector<8x8x24xi32>
    %7 = arith.negf %3 : vector<8x8x24xf32>
    %8 = math.exp %7 : vector<8x8x24xf32>
    %cst = arith.constant 1.000000e+00 : f32
    %9 = vector.broadcast %cst : f32 to vector<8x8x24xf32>
    %10 = arith.addf %9, %8 : vector<8x8x24xf32>
    %11 = arith.divf %9, %10 : vector<8x8x24xf32>
    %12 = arith.select %6, %3, %11 : vector<8x8x24xi1>, vector<8x8x24xf32>
    %13 = vector.shape_cast %12 : vector<8x8x24xf32> to vector<64x24xf32>
    %c0_3 = arith.constant 0 : index
    %c0_4 = arith.constant 0 : index
    %14 = vector.load %arg3[%c0_3, %c0_4] : memref<24x128xf32, #tpu.memory_space<vmem>>, vector<24x128xf32>
    %cst_5 = arith.constant dense<0.000000e+00> : vector<64x128xf32>
    %15 = tpu.matmul %13, %14, %cst_5 {dimension_numbers = #tpu.dot_dimension_numbers<[1], [0], [0], [1], [0, 0, 1, 1], [], []>} : vector<64x24xf32>, vector<24x128xf32>, vector<64x128xf32> -> vector<64x128xf32>
    %c0_6 = arith.constant 0 : index
    %c0_7 = arith.constant 0 : index
    %16 = vector.load %arg5[%c0_6, %c0_7] : memref<1x128xf32, #tpu.memory_space<vmem>>, vector<1x128xf32>
    %17 = vector.broadcast %16 : vector<1x128xf32> to vector<64x128xf32>
    %18 = arith.addf %15, %17 : vector<64x128xf32>
    %c0_8 = arith.constant 0 : index
    %c0_9 = arith.constant 0 : index
    %19 = vector.load %arg12[%c0_8, %c0_9] : memref<64x128xf32, #tpu.memory_space<vmem>>, vector<64x128xf32>
    tpu.vector_store %arg12[%c0_8, %c0_9], %18 {strides = array<i32>} : memref<64x128xf32, #tpu.memory_space<vmem>>, vector<64x128xf32>,
    %20 = tpu.iota {dimensions = array<i32: 1>} : vector<8x128xi32>
    %c64_i32 = arith.constant 64 : i32
    %21 = vector.broadcast %c64_i32 : i32 to vector<8x128xi32>
    %22 = arith.cmpi sge, %20, %21 : vector<8x128xi32>
    %c96_i32 = arith.constant 96 : i32
    %23 = vector.broadcast %c96_i32 : i32 to vector<8x128xi32>
    %24 = arith.cmpi slt, %20, %23 : vector<8x128xi32>
    %25 = arith.andi %22, %24 : vector<8x128xi1>
    %cst_10 = arith.constant 1.000000e+00 : f32
    %cst_11 = arith.constant 5.000000e-01 : f32
    %26 = vector.broadcast %cst_10 : f32 to vector<8x128xf32>
    %27 = vector.broadcast %cst_11 : f32 to vector<8x128xf32>
    %28 = arith.select %25, %26, %27 : vector<8x128xi1>, vector<8x128xf32>
    %cst_12 = arith.constant 0.000000e+00 : f32
    %cst_13 = arith.constant 5.000000e-01 : f32
    %29 = vector.broadcast %cst_12 : f32 to vector<8x128xf32>
    %30 = vector.broadcast %cst_13 : f32 to vector<8x128xf32>
    %31 = arith.select %25, %29, %30 : vector<8x128xi1>, vector<8x128xf32>
    %c0_14 = arith.constant 0 : index
    %c0_15 = arith.constant 0 : index
    %32 = vector.load %arg4[%c0_14, %c0_15] : memref<32x128xf32, #tpu.memory_space<vmem>>, vector<32x128xf32>
    %c0_16 = arith.constant 0 : index
    %c0_17 = arith.constant 0 : index
    %33 = vector.load %arg9[%c0_16, %c0_17] : memref<8x32xf32, #tpu.memory_space<vmem>>, vector<8x32xf32>
    %c0_18 = arith.constant 0 : index
    %c0_19 = arith.constant 0 : index
    %34 = vector.load %arg10[%c0_18, %c0_19] : memref<8x32xf32, #tpu.memory_space<vmem>>, vector<8x32xf32>
    %c0_20 = arith.constant 0 : index
    %c0_21 = arith.constant 0 : index
    %35 = vector.load %arg12[%c0_20, %c0_21] : memref<64x128xf32, #tpu.memory_space<vmem>>, vector<8x128xf32>
    %cst_22 = arith.constant dense<0.000000e+00> : vector<8x128xf32>
    %36 = tpu.matmul %33, %32, %cst_22 {dimension_numbers = #tpu.dot_dimension_numbers<[1], [0], [0], [1], [0, 0, 1, 1], [], []>} : vector<8x32xf32>, vector<32x128xf32>, vector<8x128xf32> -> vector<8x128xf32>
    %37 = arith.addf %35, %36 : vector<8x128xf32>
    %38 = arith.mulf %37, %28 : vector<8x128xf32>
    %39 = math.tanh %38 : vector<8x128xf32>
    %40 = arith.mulf %39, %28 : vector<8x128xf32>
    %41 = arith.addf %40, %31 : vector<8x128xf32>
    %42 = vector.extract_strided_slice %41 {offsets = [0, 0], sizes = [8, 32], strides = [1, 1]} : vector<8x128xf32> to vector<8x32xf32>
    %43 = vector.extract_strided_slice %41 {offsets = [0, 32], sizes = [8, 32], strides = [1, 1]} : vector<8x128xf32> to vector<8x32xf32>
    %44 = vector.extract_strided_slice %41 {offsets = [0, 64], sizes = [8, 32], strides = [1, 1]} : vector<8x128xf32> to vector<8x32xf32>
    %45 = vector.extract_strided_slice %41 {offsets = [0, 96], sizes = [8, 32], strides = [1, 1]} : vector<8x128xf32> to vector<8x32xf32>
    %46 = arith.mulf %43, %34 : vector<8x32xf32>
    %47 = arith.mulf %42, %44 : vector<8x32xf32>
    %48 = arith.addf %46, %47 : vector<8x32xf32>
    %49 = math.tanh %48 : vector<8x32xf32>
    %50 = arith.mulf %45, %49 : vector<8x32xf32>
    %c0_23 = arith.constant 0 : index
    %c0_24 = arith.constant 0 : index
    %51 = vector.load %arg11[%c0_23, %c0_24] : memref<64x32xf32, #tpu.memory_space<vmem>>, vector<8x32xf32>
    tpu.vector_store %arg11[%c0_23, %c0_24], %50 {strides = array<i32>} : memref<64x32xf32, #tpu.memory_space<vmem>>, vector<8x32xf32>,
    %c8 = arith.constant 8 : index
    %c0_25 = arith.constant 0 : index
    %52 = vector.load %arg12[%c8, %c0_25] : memref<64x128xf32, #tpu.memory_space<vmem>>, vector<8x128xf32>
    %cst_26 = arith.constant dense<0.000000e+00> : vector<8x128xf32>
    %53 = tpu.matmul %50, %32, %cst_26 {dimension_numbers = #tpu.dot_dimension_numbers<[1], [0], [0], [1], [0, 0, 1, 1], [], []>} : vector<8x32xf32>, vector<32x128xf32>, vector<8x128xf32> -> vector<8x128xf32>
    %54 = arith.addf %52, %53 : vector<8x128xf32>
    %55 = arith.mulf %54, %28 : vector<8x128xf32>
    %56 = math.tanh %55 : vector<8x128xf32>
    %57 = arith.mulf %56, %28 : vector<8x128xf32>
    %58 = arith.addf %57, %31 : vector<8x128xf32>
    %59 = vector.extract_strided_slice %58 {offsets = [0, 0], sizes = [8, 32], strides = [1, 1]} : vector<8x128xf32> to vector<8x32xf32>
    %60 = vector.extract_strided_slice %58 {offsets = [0, 32], sizes = [8, 32], strides = [1, 1]} : vector<8x128xf32> to vector<8x32xf32>
    %61 = vector.extract_strided_slice %58 {offsets = [0, 64], sizes = [8, 32], strides = [1, 1]} : vector<8x128xf32> to vector<8x32xf32>
    %62 = vector.extract_strided_slice %58 {offsets = [0, 96], sizes = [8, 32], strides = [1, 1]} : vector<8x128xf32> to vector<8x32xf32>
    %63 = arith.mulf %60, %48 : vector<8x32xf32>
    %64 = arith.mulf %59, %61 : vector<8x32xf32>
    %65 = arith.addf %63, %64 : vector<8x32xf32>
    %66 = math.tanh %65 : vector<8x32xf32>
    %67 = arith.mulf %62, %66 : vector<8x32xf32>
    %c8_27 = arith.constant 8 : index
    %c0_28 = arith.constant 0 : index
    %68 = vector.load %arg11[%c8_27, %c0_28] : memref<64x32xf32, #tpu.memory_space<vmem>>, vector<8x32xf32>
    tpu.vector_store %arg11[%c8_27, %c0_28], %67 {strides = array<i32>} : memref<64x32xf32, #tpu.memory_space<vmem>>, vector<8x32xf32>,
    %c16 = arith.constant 16 : index
    %c0_29 = arith.constant 0 : index
    %69 = vector.load %arg12[%c16, %c0_29] : memref<64x128xf32, #tpu.memory_space<vmem>>, vector<8x128xf32>
    %cst_30 = arith.constant dense<0.000000e+00> : vector<8x128xf32>
    %70 = tpu.matmul %67, %32, %cst_30 {dimension_numbers = #tpu.dot_dimension_numbers<[1], [0], [0], [1], [0, 0, 1, 1], [], []>} : vector<8x32xf32>, vector<32x128xf32>, vector<8x128xf32> -> vector<8x128xf32>
    %71 = arith.addf %69, %70 : vector<8x128xf32>
    %72 = arith.mulf %71, %28 : vector<8x128xf32>
    %73 = math.tanh %72 : vector<8x128xf32>
    %74 = arith.mulf %73, %28 : vector<8x128xf32>
    %75 = arith.addf %74, %31 : vector<8x128xf32>
    %76 = vector.extract_strided_slice %75 {offsets = [0, 0], sizes = [8, 32], strides = [1, 1]} : vector<8x128xf32> to vector<8x32xf32>
    %77 = vector.extract_strided_slice %75 {offsets = [0, 32], sizes = [8, 32], strides = [1, 1]} : vector<8x128xf32> to vector<8x32xf32>
    %78 = vector.extract_strided_slice %75 {offsets = [0, 64], sizes = [8, 32], strides = [1, 1]} : vector<8x128xf32> to vector<8x32xf32>
    %79 = vector.extract_strided_slice %75 {offsets = [0, 96], sizes = [8, 32], strides = [1, 1]} : vector<8x128xf32> to vector<8x32xf32>
    %80 = arith.mulf %77, %65 : vector<8x32xf32>
    %81 = arith.mulf %76, %78 : vector<8x32xf32>
    %82 = arith.addf %80, %81 : vector<8x32xf32>
    %83 = math.tanh %82 : vector<8x32xf32>
    %84 = arith.mulf %79, %83 : vector<8x32xf32>
    %c16_31 = arith.constant 16 : index
    %c0_32 = arith.constant 0 : index
    %85 = vector.load %arg11[%c16_31, %c0_32] : memref<64x32xf32, #tpu.memory_space<vmem>>, vector<8x32xf32>
    tpu.vector_store %arg11[%c16_31, %c0_32], %84 {strides = array<i32>} : memref<64x32xf32, #tpu.memory_space<vmem>>, vector<8x32xf32>,
    %c24 = arith.constant 24 : index
    %c0_33 = arith.constant 0 : index
    %86 = vector.load %arg12[%c24, %c0_33] : memref<64x128xf32, #tpu.memory_space<vmem>>, vector<8x128xf32>
    %cst_34 = arith.constant dense<0.000000e+00> : vector<8x128xf32>
    %87 = tpu.matmul %84, %32, %cst_34 {dimension_numbers = #tpu.dot_dimension_numbers<[1], [0], [0], [1], [0, 0, 1, 1], [], []>} : vector<8x32xf32>, vector<32x128xf32>, vector<8x128xf32> -> vector<8x128xf32>
    %88 = arith.addf %86, %87 : vector<8x128xf32>
    %89 = arith.mulf %88, %28 : vector<8x128xf32>
    %90 = math.tanh %89 : vector<8x128xf32>
    %91 = arith.mulf %90, %28 : vector<8x128xf32>
    %92 = arith.addf %91, %31 : vector<8x128xf32>
    %93 = vector.extract_strided_slice %92 {offsets = [0, 0], sizes = [8, 32], strides = [1, 1]} : vector<8x128xf32> to vector<8x32xf32>
    %94 = vector.extract_strided_slice %92 {offsets = [0, 32], sizes = [8, 32], strides = [1, 1]} : vector<8x128xf32> to vector<8x32xf32>
    %95 = vector.extract_strided_slice %92 {offsets = [0, 64], sizes = [8, 32], strides = [1, 1]} : vector<8x128xf32> to vector<8x32xf32>
    %96 = vector.extract_strided_slice %92 {offsets = [0, 96], sizes = [8, 32], strides = [1, 1]} : vector<8x128xf32> to vector<8x32xf32>
    %97 = arith.mulf %94, %82 : vector<8x32xf32>
    %98 = arith.mulf %93, %95 : vector<8x32xf32>
    %99 = arith.addf %97, %98 : vector<8x32xf32>
    %100 = math.tanh %99 : vector<8x32xf32>
    %101 = arith.mulf %96, %100 : vector<8x32xf32>
    %c24_35 = arith.constant 24 : index
    %c0_36 = arith.constant 0 : index
    %102 = vector.load %arg11[%c24_35, %c0_36] : memref<64x32xf32, #tpu.memory_space<vmem>>, vector<8x32xf32>
    tpu.vector_store %arg11[%c24_35, %c0_36], %101 {strides = array<i32>} : memref<64x32xf32, #tpu.memory_space<vmem>>, vector<8x32xf32>,
    %c32 = arith.constant 32 : index
    %c0_37 = arith.constant 0 : index
    %103 = vector.load %arg12[%c32, %c0_37] : memref<64x128xf32, #tpu.memory_space<vmem>>, vector<8x128xf32>
    %cst_38 = arith.constant dense<0.000000e+00> : vector<8x128xf32>
    %104 = tpu.matmul %101, %32, %cst_38 {dimension_numbers = #tpu.dot_dimension_numbers<[1], [0], [0], [1], [0, 0, 1, 1], [], []>} : vector<8x32xf32>, vector<32x128xf32>, vector<8x128xf32> -> vector<8x128xf32>
    %105 = arith.addf %103, %104 : vector<8x128xf32>
    %106 = arith.mulf %105, %28 : vector<8x128xf32>
    %107 = math.tanh %106 : vector<8x128xf32>
    %108 = arith.mulf %107, %28 : vector<8x128xf32>
    %109 = arith.addf %108, %31 : vector<8x128xf32>
    %110 = vector.extract_strided_slice %109 {offsets = [0, 0], sizes = [8, 32], strides = [1, 1]} : vector<8x128xf32> to vector<8x32xf32>
    %111 = vector.extract_strided_slice %109 {offsets = [0, 32], sizes = [8, 32], strides = [1, 1]} : vector<8x128xf32> to vector<8x32xf32>
    %112 = vector.extract_strided_slice %109 {offsets = [0, 64], sizes = [8, 32], strides = [1, 1]} : vector<8x128xf32> to vector<8x32xf32>
    %113 = vector.extract_strided_slice %109 {offsets = [0, 96], sizes = [8, 32], strides = [1, 1]} : vector<8x128xf32> to vector<8x32xf32>
    %114 = arith.mulf %111, %99 : vector<8x32xf32>
    %115 = arith.mulf %110, %112 : vector<8x32xf32>
    %116 = arith.addf %114, %115 : vector<8x32xf32>
    %117 = math.tanh %116 : vector<8x32xf32>
    %118 = arith.mulf %113, %117 : vector<8x32xf32>
    %c32_39 = arith.constant 32 : index
    %c0_40 = arith.constant 0 : index
    %119 = vector.load %arg11[%c32_39, %c0_40] : memref<64x32xf32, #tpu.memory_space<vmem>>, vector<8x32xf32>
    tpu.vector_store %arg11[%c32_39, %c0_40], %118 {strides = array<i32>} : memref<64x32xf32, #tpu.memory_space<vmem>>, vector<8x32xf32>,
    %c40 = arith.constant 40 : index
    %c0_41 = arith.constant 0 : index
    %120 = vector.load %arg12[%c40, %c0_41] : memref<64x128xf32, #tpu.memory_space<vmem>>, vector<8x128xf32>
    %cst_42 = arith.constant dense<0.000000e+00> : vector<8x128xf32>
    %121 = tpu.matmul %118, %32, %cst_42 {dimension_numbers = #tpu.dot_dimension_numbers<[1], [0], [0], [1], [0, 0, 1, 1], [], []>} : vector<8x32xf32>, vector<32x128xf32>, vector<8x128xf32> -> vector<8x128xf32>
    %122 = arith.addf %120, %121 : vector<8x128xf32>
    %123 = arith.mulf %122, %28 : vector<8x128xf32>
    %124 = math.tanh %123 : vector<8x128xf32>
    %125 = arith.mulf %124, %28 : vector<8x128xf32>
    %126 = arith.addf %125, %31 : vector<8x128xf32>
    %127 = vector.extract_strided_slice %126 {offsets = [0, 0], sizes = [8, 32], strides = [1, 1]} : vector<8x128xf32> to vector<8x32xf32>
    %128 = vector.extract_strided_slice %126 {offsets = [0, 32], sizes = [8, 32], strides = [1, 1]} : vector<8x128xf32> to vector<8x32xf32>
    %129 = vector.extract_strided_slice %126 {offsets = [0, 64], sizes = [8, 32], strides = [1, 1]} : vector<8x128xf32> to vector<8x32xf32>
    %130 = vector.extract_strided_slice %126 {offsets = [0, 96], sizes = [8, 32], strides = [1, 1]} : vector<8x128xf32> to vector<8x32xf32>
    %131 = arith.mulf %128, %116 : vector<8x32xf32>
    %132 = arith.mulf %127, %129 : vector<8x32xf32>
    %133 = arith.addf %131, %132 : vector<8x32xf32>
    %134 = math.tanh %133 : vector<8x32xf32>
    %135 = arith.mulf %130, %134 : vector<8x32xf32>
    %c40_43 = arith.constant 40 : index
    %c0_44 = arith.constant 0 : index
    %136 = vector.load %arg11[%c40_43, %c0_44] : memref<64x32xf32, #tpu.memory_space<vmem>>, vector<8x32xf32>
    tpu.vector_store %arg11[%c40_43, %c0_44], %135 {strides = array<i32>} : memref<64x32xf32, #tpu.memory_space<vmem>>, vector<8x32xf32>,
    %c48 = arith.constant 48 : index
    %c0_45 = arith.constant 0 : index
    %137 = vector.load %arg12[%c48, %c0_45] : memref<64x128xf32, #tpu.memory_space<vmem>>, vector<8x128xf32>
    %cst_46 = arith.constant dense<0.000000e+00> : vector<8x128xf32>
    %138 = tpu.matmul %135, %32, %cst_46 {dimension_numbers = #tpu.dot_dimension_numbers<[1], [0], [0], [1], [0, 0, 1, 1], [], []>} : vector<8x32xf32>, vector<32x128xf32>, vector<8x128xf32> -> vector<8x128xf32>
    %139 = arith.addf %137, %138 : vector<8x128xf32>
    %140 = arith.mulf %139, %28 : vector<8x128xf32>
    %141 = math.tanh %140 : vector<8x128xf32>
    %142 = arith.mulf %141, %28 : vector<8x128xf32>
    %143 = arith.addf %142, %31 : vector<8x128xf32>
    %144 = vector.extract_strided_slice %143 {offsets = [0, 0], sizes = [8, 32], strides = [1, 1]} : vector<8x128xf32> to vector<8x32xf32>
    %145 = vector.extract_strided_slice %143 {offsets = [0, 32], sizes = [8, 32], strides = [1, 1]} : vector<8x128xf32> to vector<8x32xf32>
    %146 = vector.extract_strided_slice %143 {offsets = [0, 64], sizes = [8, 32], strides = [1, 1]} : vector<8x128xf32> to vector<8x32xf32>
    %147 = vector.extract_strided_slice %143 {offsets = [0, 96], sizes = [8, 32], strides = [1, 1]} : vector<8x128xf32> to vector<8x32xf32>
    %148 = arith.mulf %145, %133 : vector<8x32xf32>
    %149 = arith.mulf %144, %146 : vector<8x32xf32>
    %150 = arith.addf %148, %149 : vector<8x32xf32>
    %151 = math.tanh %150 : vector<8x32xf32>
    %152 = arith.mulf %147, %151 : vector<8x32xf32>
    %c48_47 = arith.constant 48 : index
    %c0_48 = arith.constant 0 : index
    %153 = vector.load %arg11[%c48_47, %c0_48] : memref<64x32xf32, #tpu.memory_space<vmem>>, vector<8x32xf32>
    tpu.vector_store %arg11[%c48_47, %c0_48], %152 {strides = array<i32>} : memref<64x32xf32, #tpu.memory_space<vmem>>, vector<8x32xf32>,
    %c56 = arith.constant 56 : index
    %c0_49 = arith.constant 0 : index
    %154 = vector.load %arg12[%c56, %c0_49] : memref<64x128xf32, #tpu.memory_space<vmem>>, vector<8x128xf32>
    %cst_50 = arith.constant dense<0.000000e+00> : vector<8x128xf32>
    %155 = tpu.matmul %152, %32, %cst_50 {dimension_numbers = #tpu.dot_dimension_numbers<[1], [0], [0], [1], [0, 0, 1, 1], [], []>} : vector<8x32xf32>, vector<32x128xf32>, vector<8x128xf32> -> vector<8x128xf32>
    %156 = arith.addf %154, %155 : vector<8x128xf32>
    %157 = arith.mulf %156, %28 : vector<8x128xf32>
    %158 = math.tanh %157 : vector<8x128xf32>
    %159 = arith.mulf %158, %28 : vector<8x128xf32>
    %160 = arith.addf %159, %31 : vector<8x128xf32>
    %161 = vector.extract_strided_slice %160 {offsets = [0, 0], sizes = [8, 32], strides = [1, 1]} : vector<8x128xf32> to vector<8x32xf32>
    %162 = vector.extract_strided_slice %160 {offsets = [0, 32], sizes = [8, 32], strides = [1, 1]} : vector<8x128xf32> to vector<8x32xf32>
    %163 = vector.extract_strided_slice %160 {offsets = [0, 64], sizes = [8, 32], strides = [1, 1]} : vector<8x128xf32> to vector<8x32xf32>
    %164 = vector.extract_strided_slice %160 {offsets = [0, 96], sizes = [8, 32], strides = [1, 1]} : vector<8x128xf32> to vector<8x32xf32>
    %165 = arith.mulf %162, %150 : vector<8x32xf32>
    %166 = arith.mulf %161, %163 : vector<8x32xf32>
    %167 = arith.addf %165, %166 : vector<8x32xf32>
    %168 = math.tanh %167 : vector<8x32xf32>
    %169 = arith.mulf %164, %168 : vector<8x32xf32>
    %c56_51 = arith.constant 56 : index
    %c0_52 = arith.constant 0 : index
    %170 = vector.load %arg11[%c56_51, %c0_52] : memref<64x32xf32, #tpu.memory_space<vmem>>, vector<8x32xf32>
    tpu.vector_store %arg11[%c56_51, %c0_52], %169 {strides = array<i32>} : memref<64x32xf32, #tpu.memory_space<vmem>>, vector<8x32xf32>,
    %c0_53 = arith.constant 0 : index
    %c0_54 = arith.constant 0 : index
    %171 = vector.load %arg9[%c0_53, %c0_54] : memref<8x32xf32, #tpu.memory_space<vmem>>, vector<8x32xf32>
    tpu.vector_store %arg9[%c0_53, %c0_54], %169 {strides = array<i32>} : memref<8x32xf32, #tpu.memory_space<vmem>>, vector<8x32xf32>,
    %c0_55 = arith.constant 0 : index
    %c0_56 = arith.constant 0 : index
    %172 = vector.load %arg10[%c0_55, %c0_56] : memref<8x32xf32, #tpu.memory_space<vmem>>, vector<8x32xf32>
    tpu.vector_store %arg10[%c0_55, %c0_56], %167 {strides = array<i32>} : memref<8x32xf32, #tpu.memory_space<vmem>>, vector<8x32xf32>,
    %c0_57 = arith.constant 0 : index
    %c0_58 = arith.constant 0 : index
    %173 = vector.load %arg11[%c0_57, %c0_58] : memref<64x32xf32, #tpu.memory_space<vmem>>, vector<64x32xf32>
    %c0_59 = arith.constant 0 : index
    %c0_60 = arith.constant 0 : index
    %174 = vector.load %arg6[%c0_59, %c0_60] : memref<32x128xf32, #tpu.memory_space<vmem>>, vector<32x128xf32>
    %cst_61 = arith.constant dense<0.000000e+00> : vector<64x128xf32>
    %175 = tpu.matmul %173, %174, %cst_61 {dimension_numbers = #tpu.dot_dimension_numbers<[1], [0], [0], [1], [0, 0, 1, 1], [], []>} : vector<64x32xf32>, vector<32x128xf32>, vector<64x128xf32> -> vector<64x128xf32>
    %c0_62 = arith.constant 0 : index
    %c0_63 = arith.constant 0 : index
    %176 = vector.load %arg7[%c0_62, %c0_63] : memref<1x128xf32, #tpu.memory_space<vmem>>, vector<1x128xf32>
    %177 = vector.broadcast %176 : vector<1x128xf32> to vector<64x128xf32>
    %178 = arith.addf %175, %177 : vector<64x128xf32>
    %179 = vector.shape_cast %178 : vector<64x128xf32> to vector<8x8x128xf32>
    %c0_64 = arith.constant 0 : index
    %c0_65 = arith.constant 0 : index
    %c0_66 = arith.constant 0 : index
    %180 = vector.load %arg8[%c0_64, %c0_65, %c0_66] : memref<8x8x128xf32, #tpu.memory_space<vmem>>, vector<8x8x128xf32>
    tpu.vector_store %arg8[%c0_64, %c0_65, %c0_66], %179 {strides = array<i32>} : memref<8x8x128xf32, #tpu.memory_space<vmem>>, vector<8x8x128xf32>,
    return
  }
  func.func @transform_0(%arg0: i32, %arg1: i32) -> (i32, i32, i32) {
    %c0_i32 = arith.constant 0 : i32
    %c0_i32_0 = arith.constant 0 : i32
    return %arg1, %arg0, %c0_i32 : i32, i32, i32
  }
  func.func @transform_1(%arg0: i32, %arg1: i32) -> (i32, i32) {
    %c0_i32 = arith.constant 0 : i32
    %c0_i32_0 = arith.constant 0 : i32
    %c0_i32_1 = arith.constant 0 : i32
    return %c0_i32, %c0_i32_0 : i32, i32
  }
  func.func @transform_2(%arg0: i32, %arg1: i32) -> (i32, i32) {
    %c0_i32 = arith.constant 0 : i32
    %c0_i32_0 = arith.constant 0 : i32
    %c0_i32_1 = arith.constant 0 : i32
    return %c0_i32, %c0_i32_0 : i32, i32
  }
  func.func @transform_3(%arg0: i32, %arg1: i32) -> (i32, i32) {
    %c0_i32 = arith.constant 0 : i32
    %c0_i32_0 = arith.constant 0 : i32
    %c0_i32_1 = arith.constant 0 : i32
    return %c0_i32, %c0_i32_0 : i32, i32
  }
  func.func @transform_4(%arg0: i32, %arg1: i32) -> (i32, i32) {
    %c0_i32 = arith.constant 0 : i32
    %c0_i32_0 = arith.constant 0 : i32
    %c0_i32_1 = arith.constant 0 : i32
    return %c0_i32, %c0_i32_0 : i32, i32
  }
  func.func @transform_5(%arg0: i32, %arg1: i32) -> (i32, i32) {
    %c0_i32 = arith.constant 0 : i32
    %c0_i32_0 = arith.constant 0 : i32
    %c0_i32_1 = arith.constant 0 : i32
    return %c0_i32, %c0_i32_0 : i32, i32
  }
  func.func @transform_6(%arg0: i32, %arg1: i32) -> (i32, i32, i32) {
    %c0_i32 = arith.constant 0 : i32
    %c0_i32_0 = arith.constant 0 : i32
    return %arg1, %arg0, %c0_i32 : i32, i32, i32
  }
}

</mosaic_0001>

<bundles_post_ra>
// kernel: tpu_custom_call.1
= control target key start
LH: loop header
LB: loop body
LE: loop exit
PB: predicated region body
PF: predicated region fallthrough
CT: control target
= control target key end

     0   :  { %11 = vsyncpa [#allocation7], 0  ;;  %s2142_s0 = inlined_call_operand.hbm [shape: f32[8,8,24], index: 0, kind: input, shape index: {}]   ;;  %s2143_s1 = inlined_call_operand.hbm [shape: f32[24,128], index: 1, kind: input, shape index: {}]   ;;  %s2144_s2 = inlined_call_operand.hbm [shape: f32[32,128], index: 2, kind: input, shape index: {}]   ;;  %s2145_s3 = inlined_call_operand.vmem [shape: f32[1,128], index: 3, kind: input, shape index: {}]   ;;  %s2146_s4 = inlined_call_operand.hbm [shape: f32[32,128], index: 4, kind: input, shape index: {}]   ;;  %s2147_s5 = inlined_call_operand.vmem [shape: f32[1,128], index: 5, kind: input, shape index: {}]   ;;  %s2148_s6 = inlined_call_operand.hbm [shape: f32[8,8,128], index: 6, kind: output, shape index: {}]  }
   0x1   :  { %12 = vsyncpa [#allocation10], 0 }
   0x2   :  { %13 = vsyncpa [#allocation13], 0 }
   0x3   :  { %14 = vsyncpa [#allocation8], 0  ;;  %s1782_s21 = smov [#allocation9]   ;;  %s1783_s23 = smov [#allocation6]  }
   0x4   :  { %s32_s22 = sshll.u32 %s1782_s21, 4  ;;  %s20_s24 = sshll.u32 %s1783_s23, 4  ;;  %s33_s22 = int_to_ptr.vmem [resolvable:$true] %s32_s22  ;;  %s1831_s24 = int_to_ptr.vmem [resolvable:$true] %s20_s24 }
   0x5   :  { %s1664_s27 = scalar_lea.hbm %s2143_s1, 384 }
   0x6   :  { %p1665_p0 = scmp.ne.s32.totalorder %s2143_s1, %s1664_s27  ;;  %p1668_p1 = scmp.lt.u32.totalorder %s1664_s27, %s2143_s1 }
   0x8   :  { %p1670_p2 = pnand %p1668_p1, %p1665_p0 }
   0xa   :  { %1673 = shalt.err (!%p1670_p2)
}
   0xb   :  { %s1674_s8 = scalar_lea.vmem %s33_s22, 384  ;;  %p1679_p4 = scmp.lt.s32.totalorder %s33_s22, %s33_s22 }
   0xc   :  { %p1675_p3 = scmp.ne.s32.totalorder %s33_s22, %s1674_s8  ;;  %p1680_p5 = scmp.lt.s32.totalorder %s1674_s8, %s1674_s8 }
   0xe   :  { %p1681_p6 = por %p1680_p5, %p1679_p4 }
  0x10   :  { %p1682_p7 = pnand %p1681_p6, %p1675_p3 }
  0x12   :  { %1685 = shalt.err (!%p1682_p7)
}
  0x13   :  { %s1784_s9 = smov 128   ;;  %s1785_s10 = smov 8  }
  0x14   :  { %38 = dma.hbm_to_vmem [thread:$0]  %s2143_s1, 384, %s33_s22, [#allocation10], %s1784_s9, %s1784_s9, %s1785_s10  }
  0x15   :  { %s1686_s15 = scalar_lea.hbm %s2142_s0, 1024 }
  0x16   :  { %p1687_p8 = scmp.ne.s32.totalorder %s2142_s0, %s1686_s15  ;;  %p1690_p9 = scmp.lt.u32.totalorder %s1686_s15, %s2142_s0 }
  0x18   :  { %p1692_p10 = pnand %p1690_p9, %p1687_p8 }
  0x1a   :  { %1695 = shalt.err (!%p1692_p10)
}
  0x1b   :  { %s1696_s20 = scalar_lea.vmem %s1831_s24, 1024  ;;  %p1701_p12 = scmp.lt.s32.totalorder %s1831_s24, %s1831_s24 }
  0x1c   :  { %p1697_p11 = scmp.ne.s32.totalorder %s1831_s24, %s1696_s20  ;;  %p1702_p13 = scmp.lt.s32.totalorder %s1696_s20, %s1696_s20 }
  0x1e   :  { %p1703_p0 = por %p1702_p13, %p1701_p12 }
  0x20   :  { %p1704_p1 = pnand %p1703_p0, %p1697_p11 }
  0x22   :  { %1707 = shalt.err (!%p1704_p1)
}
  0x23   :  { %26 = dma.hbm_to_vmem [thread:$0]  %s2142_s0, 1024, %s1831_s24, [#allocation7], %s1784_s9, %s1784_s9, %s1785_s10  }
  0x24   :  { %s1786_s22 = smov [#allocation11]   ;;  %s1787_s25 = smov [#allocation12]  }
  0x25   :  { %s44_s23 = sshll.u32 %s1786_s22, 4  ;;  %s58_s26 = sshll.u32 %s1787_s25, 4  ;;  %s45_s23 = int_to_ptr.vmem [resolvable:$true] %s44_s23  ;;  %s1868_s26 = int_to_ptr.vmem [resolvable:$true] %s58_s26 }
  0x26   :  { %s1708_s29 = scalar_lea.hbm %s2144_s2, 512 }
  0x27   :  { %p1709_p2 = scmp.ne.s32.totalorder %s2144_s2, %s1708_s29  ;;  %p1712_p3 = scmp.lt.u32.totalorder %s1708_s29, %s2144_s2 }
  0x29   :  { %p1714_p4 = pnand %p1712_p3, %p1709_p2 }
  0x2b   :  { %1717 = shalt.err (!%p1714_p4)
}
  0x2c   :  { %s1718_s0 = scalar_lea.vmem %s45_s23, 512  ;;  %p1723_p6 = scmp.lt.s32.totalorder %s45_s23, %s45_s23 }
  0x2d   :  { %p1719_p5 = scmp.ne.s32.totalorder %s45_s23, %s1718_s0  ;;  %p1724_p7 = scmp.lt.s32.totalorder %s1718_s0, %s1718_s0 }
  0x2f   :  { %p1725_p8 = por %p1724_p7, %p1723_p6 }
  0x31   :  { %p1726_p9 = pnand %p1725_p8, %p1719_p5 }
  0x33   :  { %1729 = shalt.err (!%p1726_p9)
}
  0x34   :  { %50 = dma.hbm_to_vmem [thread:$0]  %s2144_s2, 512, %s45_s23, [#allocation10], %s1784_s9, %s1784_s9, %s1785_s10  }
  0x35   :  { %s1730_s15 = scalar_lea.hbm %s2146_s4, 512 }
  0x36   :  { %p1731_p10 = scmp.ne.s32.totalorder %s2146_s4, %s1730_s15  ;;  %p1734_p11 = scmp.lt.u32.totalorder %s1730_s15, %s2146_s4 }
  0x38   :  { %p1736_p12 = pnand %p1734_p11, %p1731_p10 }
  0x3a   :  { %1739 = shalt.err (!%p1736_p12)
}
  0x3b   :  { %s1740_s20 = scalar_lea.vmem %s1868_s26, 512  ;;  %p1745_p0 = scmp.lt.s32.totalorder %s1868_s26, %s1868_s26 }
  0x3c   :  { %p1741_p13 = scmp.ne.s32.totalorder %s1868_s26, %s1740_s20  ;;  %p1746_p1 = scmp.lt.s32.totalorder %s1740_s20, %s1740_s20 }
  0x3e   :  { %p1747_p2 = por %p1746_p1, %p1745_p0 }
  0x40   :  { %p1748_p3 = pnand %p1747_p2, %p1741_p13 }
  0x42   :  { %1751 = shalt.err (!%p1748_p3)
}
  0x43   :  { %64 = dma.hbm_to_vmem [thread:$0]  %s2146_s4, 512, %s1868_s26, [#allocation13], %s1784_s9, %s1784_s9, %s1785_s10  }
  0x44   :  { %1774 = dma.done.wait [#allocation7], 1024  }
  0x45   :  { %1775 = vsyncadd [#allocation7], 4294966272 }
  0x46   :  { %1776 = dma.done.wait [#allocation10], 896  }
  0x47   :  { %1777 = vsyncadd [#allocation10], 4294966400 }
  0x48   :  { %1778 = dma.done.wait [#allocation13], 512  }
  0x49   :  { %1779 = vsyncadd [#allocation13], 4294966784  ;;  %vm83_vm0 = vcmask 261120   ;;  %v1788_v0 = vmov 0.0   ;;  %v153_v1 = vld [vmem:[#allocation9] sm:$0xff]  ;;  %v154_v2 = vld [vmem:[#allocation9 + $0x8] sm:$0xff]  ;;  %v94_v24 = vlaneseq }
  0x4a   :  { %84 = vst.msk [vmem:[#allocation2] sm:$0xff] %vm83_vm0, %v1788_v0  ;;  %85 = vst.msk [vmem:[#allocation3] sm:$0xff] %vm83_vm0, %v1788_v0  ;;  %v1522_v3 = vpack.c.bf16 %v154_v2, %v153_v1  ;;  %v90_v4 = vld [vmem:[#allocation6 + $0x20] sm:$0xff]  ;;  %v91_v5 = vld [vmem:[#allocation6 + $0x28] sm:$0xff]  ;;  %v1789_v17 = vmov 0.0|0.0   ;;  %vm163_vm2 = vcmask 195584  }
  0x4b   :  { %v155_v6 = vld [vmem:[#allocation9 + $0x10] sm:$0xff]  ;;  %v1303_v7 = vmul.f32 -1.442695, %v90_v4  ;;  %v1304_v8 = vmul.f32 -1.442695, %v91_v5  ;;  %v86_v9 = vld [vmem:[#allocation6] sm:$0xff] }
  0x4c   :  { %1582 = vmatprep.subr.bf16.mxu1 %v1522_v3  ;;  %1523 = vmatprep.subr.bf16.mxu0 %v1522_v3  ;;  %v1299_v10 = vmul.f32 -1.442695, %v86_v9  ;;  %v92_v11 = vld [vmem:[#allocation6 + $0x30] sm:$0xff]  ;;  %v1909_v12 = vld [vmem:[#allocation6 + $0x8] sm:$0xff]  ;;  %v1911_v13 = vld [vmem:[#allocation6 + $0x38] sm:$0xff]  ;;  %v1917_v31 = vand.u32 127, %v94_v24 }
  0x4d   :  { %1584 = vmatpush3.bf16.msra.mxu1 %v1522_v3  ;;  %1525 = vmatpush3.bf16.msra.mxu0 %v1522_v3  ;;  %1600 = vpow2.f32 %v1303_v7  ;;  %v1305_v14 = vmul.f32 -1.442695, %v92_v11  ;;  %v1300_v15 = vmul.f32 -1.442695, %v1909_v12  ;;  %v1306_v16 = vmul.f32 -1.442695, %v1911_v13 }
  0x4e   :  { %1583 = vmatprep.subr.mxu1 %v155_v6  ;;  %1602 = vpow2.f32 %v1304_v8  ;;  %1400 = vmatprep.subr.mxu0 %v155_v6  ;;  %v306_v32 = vld [vmem:[#allocation11] sm:$0xff]  ;;  %v307_v33 = vld [vmem:[#allocation11 + $0x8] sm:$0xff]  ;;  %vm96_vm1 = vcmp.lt.s32.totalorder %v1917_v31, 20  ;;  %v308_v38 = vld [vmem:[#allocation11 + $0x10] sm:$0xff]  ;;  %vm1790_vm3 = vmmov 0   ;;  %vm301_vm4 = vcmp.ge.s32.totalorder %v1917_v31, 64 }
  0x4f   :  { %1604 = vpow2.f32 %v1299_v10  ;;  %v1920_v35 = vpack.c.bf16 %v307_v33, %v306_v32  ;;  %v309_v39 = vld [vmem:[#allocation11 + $0x18] sm:$0xff]  ;;  %vm302_vm5 = vcmp.lt.s32.totalorder %v1917_v31, 96  ;;  %v1791_v59 = vmov 0.5   ;;  %s1793_s22 = smov 32   ;;  %v89_v33 = vld [vmem:[#allocation6 + $0x18] sm:$0xff]  ;;  %s1795_s26 = smov [#allocation14]  }
  0x50   :  { %1606 = vpow2.f32 %v1305_v14  ;;  %v1934_v46 = vpack.c.bf16 %v309_v39, %v308_v38  ;;  %v1970_v54 = vld [vmem:[%s2145_s3] ss:$0 sm:$0xff]  ;;  %vm303_vm6 = vmand %vm301_vm4, %vm302_vm5  ;;  %s1792_s3 = smov 64   ;;  %s1285_s27 = sshll.u32 %s1795_s26, 4  ;;  %s1286_s27 = int_to_ptr.vmem [resolvable:$true] %s1285_s27 }
  0x51   :  { %1585 = vmatpush3.msra.mxu1 %v155_v6  ;;  %1401 = vmatpush3.msra.mxu0 %v155_v6  ;;  %1608 = vpow2.f32 %v1300_v15  ;;  %v310_v50 = vld [vmem:[#allocation2] sm:$0xff]  ;;  %v1977_v60 = vsel %vm303_vm6, 1.0, %v1791_v59  ;;  %v1980_v3 = vsel %vm303_vm6, 0.0, %v1791_v59  ;;  %v311_v6 = vld [vmem:[#allocation3] sm:$0xff]  ;;  %s1752_s28 = scalar_lea.vmem %s1286_s27, 1024  ;;  %p1757_p5 = scmp.lt.s32.totalorder %s1286_s27, %s1286_s27 }
  0x52   :  { %1526 = vmatprep.subr.bf16.mxu1 %v1789_v17  ;;  %1610 = vpow2.f32 %v1306_v16  ;;  %1538 = vmatprep.subr.bf16.mxu0 %v1789_v17  ;;  %v88_v32 = vld [vmem:[#allocation6 + $0x10] sm:$0xff]  ;;  %p1753_p4 = scmp.ne.s32.totalorder %s1286_s27, %s1752_s28  ;;  %p1758_p6 = scmp.lt.s32.totalorder %s1752_s28, %s1752_s28 }
  0x54   :  { %p1759_p7 = por %p1758_p6, %p1757_p5 }
  0x56   :  { %p1760_p8 = pnand %p1759_p7, %p1753_p4 }
  0x57   :  { %v1601_v18 = vpop.eup %1600 }
  0x58   :  { %v1603_v19 = vpop.eup %1602  ;;  %v125_v20 = vadd.f32 1.0, %v1601_v18 }
  0x59   :  { %v1605_v21 = vpop.eup %1604  ;;  %v126_v22 = vadd.f32 1.0, %v1603_v19 }
  0x5a   :  { %v1607_v23 = vpop.eup %1606  ;;  %1612 = vrcp.f32 %v125_v20  ;;  %v121_v25 = vadd.f32 1.0, %v1605_v21 }
  0x5b   :  { %v1609_v26 = vpop.eup %1608  ;;  %1614 = vrcp.f32 %v126_v22  ;;  %v127_v27 = vadd.f32 1.0, %v1607_v23 }
  0x5c   :  { %v1611_v28 = vpop.eup %1610  ;;  %1616 = vrcp.f32 %v121_v25  ;;  %v122_v29 = vadd.f32 1.0, %v1609_v26 }
  0x5d   :  { %1618 = vrcp.f32 %v127_v27  ;;  %v128_v30 = vadd.f32 1.0, %v1611_v28 }
  0x5e   :  { %1620 = vrcp.f32 %v122_v29 }
  0x5f   :  { %1622 = vrcp.f32 %v128_v30 }
  0x64   :  { %v1613_v34 = vpop.eup %1612 }
  0x65   :  { %v1615_v36 = vpop.eup %1614  ;;  %v149_v37 = vsel %vm96_vm1, %v90_v4, %v1613_v34  ;;  %v1301_v34 = vmul.f32 -1.442695, %v88_v32 }
  0x66   :  { %v1617_v40 = vpop.eup %1616  ;;  %1408 = vmatprep.mubr.msk.f32.mxu1 %vm163_vm2, %v149_v37  ;;  %v150_v41 = vsel %vm96_vm1, %v91_v5, %v1615_v36  ;;  %v1302_v36 = vmul.f32 -1.442695, %v89_v33 }
  0x67   :  { %v1619_v42 = vpop.eup %1618  ;;  %1409 = vmatmul.mubr.msk.f32.vlgmr.msra.gmra.mrb[0].mxu1 %vm163_vm2, %v150_v41  ;;  %v145_v43 = vsel %vm96_vm1, %v86_v9, %v1617_v40 }
  0x68   :  { %v1621_v44 = vpop.eup %1620  ;;  %1528 = vmatpush3.bf16.msra.mxu1 %v1920_v35  ;;  %1402 = vmatprep.mubr.msk.f32.mxu0 %vm163_vm2, %v145_v43  ;;  %v151_v45 = vsel %vm96_vm1, %v92_v11, %v1619_v42 }
  0x69   :  { %v1623_v47 = vpop.eup %1622  ;;  %1411 = vmatprep.mubr.msk.f32.mxu1 %vm163_vm2, %v151_v45  ;;  %1529 = vmatprep.subr.bf16.mxu1 %v1789_v17  ;;  %v146_v48 = vsel %vm96_vm1, %v1909_v12, %v1621_v44 }
  0x6a   :  { %1403 = vmatmul.mubr.msk.f32.vlgmr.msra.gmra.mrb[0].mxu0 %vm163_vm2, %v146_v48  ;;  %v152_v49 = vsel %vm96_vm1, %v1911_v13, %v1623_v47 }
  0x6b   :  { %1412 = vmatmul.mubr.msk.f32.gmra.mrb[2].mxu1 %vm163_vm2, %v152_v49  ;;  %1540 = vmatpush3.bf16.msra.mxu0 %v1920_v35 }
  0x6c   :  { %1531 = vmatpush3.bf16.msra.mxu1 %v1934_v46  ;;  %1422 = vmatprep.mubr.msk.f32.mxu1 %vm1790_vm3, %v1788_v0 }
  0x6d   :  { %1532 = vmatprep.subr.bf16.mxu1 %v1789_v17  ;;  %1541 = vmatprep.subr.bf16.mxu0 %v1789_v17 }
  0x6f   :  { %1423 = vmatmul.mubr.msk.f32.vlgmr.msra.gmra.mrb[4].mxu1 %vm83_vm0, %v310_v50  ;;  %1543 = vmatpush3.bf16.msra.mxu0 %v1934_v46 }
  0x70   :  { %1534 = vmatpush3.bf16.msra.mxu1 %v1920_v35  ;;  %1433 = vmatprep.mubr.msk.f32.mxu1 %vm1790_vm3, %v1788_v0 }
  0x71   :  { %1535 = vmatprep.subr.bf16.mxu1 %v1789_v17  ;;  %1550 = vmatprep.subr.bf16.mxu0 %v1789_v17 }
  0x74   :  { %1537 = vmatpush3.bf16.msra.mxu1 %v1934_v46 }
  0x75   :  { %1544 = vmatprep.subr.bf16.mxu1 %v1789_v17 }
 0x13a   :  { %v1961_v51 = vpop.f32.mrb[0].mxu1 }
 0x13b   :  { %v1963_v52 = vpop.f32.mrb[1].mxu1 }
 0x13d   :  { %v1404_v53 = vpop.f32.mrb[0].mxu0 }
 0x13e   :  { %v1972_v55 = vpop.f32.mrb[2].mxu1  ;;  %v254_v56 = vpop.f32.mrb[1].mxu0  ;;  %v260_v18 = vadd.f32 %v1404_v53, %v1970_v54 }
 0x13f   :  { %v255_v57 = vadd.f32 %v1970_v54, %v254_v56  ;;  %v1975_v58 = vpop.f32.mrb[3].mxu1 }
 0x142   :  { %v383_v61 = vpop.f32.mrb[4].mxu1 }
 0x143   :  { %v387_v62 = vadd.f32 %v383_v61, %v255_v57  ;;  %v1424_v63 = vpop.f32.mrb[5].mxu1 }
 0x145   :  { %v388_v1 = vmul.f32 %v387_v62, %v1977_v60 }
 0x147   :  { %1624 = vtanh.f32 %v388_v1 }
 0x151   :  { %v1625_v2 = vpop.eup %1624 }
 0x152   :  { %v390_v4 = vmul.f32 %v1625_v2, %v1977_v60 }
 0x154   :  { %v391_v5 = vadd.f32 %v390_v4, %v1980_v3 }
 0x156   :  { %398 = vrot.lane.b32.xlu0 %v391_v5, %s1792_s3 }
 0x15a   :  { %393 = vrot.lane.b32.xlu0 %v311_v6, %s1793_s22 }
 0x1c8   :  { %v399_v7 = vpop.permute.xlu0 %398 }
 0x1c9   :  { %v401_v8 = vmul.f32 %v399_v7, %v391_v5 }
 0x1cb   :  { %403 = vrot.lane.b32.xlu1 %v401_v8, %s1793_s22 }
 0x1cc   :  { %v394_v9 = vpop.permute.xlu0 %393 }
 0x1cd   :  { %v396_v10 = vmul.f32 %v394_v9, %v391_v5 }
 0x23d   :  { %v404_v11 = vpop.permute.xlu1 %403 }
 0x23e   :  { %v406_v12 = vadd.f32 %v404_v11, %v396_v10 }
 0x240   :  { %1626 = vtanh.f32 %v406_v12 }
 0x24a   :  { %v1627_v13 = vpop.eup %1626 }
 0x24b   :  { %409 = vrot.lane.b32.xlu1 %v1627_v13, %s1792_s3 }
 0x2bd   :  { %v410_v14 = vpop.permute.xlu1 %409 }
 0x2be   :  { %v412_v15 = vmul.f32 %v410_v14, %v391_v5 }
 0x2c0   :  { %414 = vrot.lane.b32.xlu0 %v412_v15, %s1793_s22 }
 0x332   :  { %v415_v16 = vpop.permute.xlu0 %414 }
 0x333   :  { %417 = vst.msk [vmem:[#allocation4] sm:$0xff] %vm83_vm0, %v415_v16  ;;  %1434 = vmatmul.mubr.msk.f32.vlgmr.msra.gmra.mrb[6].mxu1 %vm83_vm0, %v415_v16 }
 0x334   :  { %1546 = vmatpush3.bf16.msra.mxu1 %v1920_v35  ;;  %1455 = vmatprep.mubr.msk.f32.mxu1 %vm1790_vm3, %v1788_v0 }
 0x335   :  { %1547 = vmatprep.subr.bf16.mxu1 %v1789_v17 }
 0x338   :  { %1549 = vmatpush3.bf16.msra.mxu1 %v1934_v46 }
 0x339   :  { %1556 = vmatprep.subr.bf16.mxu1 %v1789_v17 }
 0x406   :  { %v487_v19 = vpop.f32.mrb[6].mxu1 }
 0x407   :  { %v491_v20 = vadd.f32 %v487_v19, %v260_v18  ;;  %v1435_v21 = vpop.f32.mrb[7].mxu1 }
 0x409   :  { %v492_v22 = vmul.f32 %v491_v20, %v1977_v60 }
 0x40b   :  { %1628 = vtanh.f32 %v492_v22 }
 0x415   :  { %v1629_v23 = vpop.eup %1628 }
 0x416   :  { %v494_v24 = vmul.f32 %v1629_v23, %v1977_v60 }
 0x418   :  { %v495_v25 = vadd.f32 %v494_v24, %v1980_v3 }
 0x41a   :  { %498 = vrot.lane.b32.xlu1 %v495_v25, %s1792_s3  ;;  %v496_v28 = vmul.f32 %v495_v25, %v406_v12 }
 0x48c   :  { %v499_v26 = vpop.permute.xlu1 %498 }
 0x48d   :  { %v501_v27 = vmul.f32 %v499_v26, %v495_v25 }
 0x48f   :  { %503 = vrot.lane.b32.xlu0 %v501_v27, %s1793_s22 }
 0x501   :  { %v504_v29 = vpop.permute.xlu0 %503 }
 0x502   :  { %v506_v30 = vadd.f32 %v504_v29, %v496_v28 }
 0x504   :  { %1630 = vtanh.f32 %v506_v30 }
 0x505   :  { %1632 = vpow2.f32 %v1301_v34 }
 0x506   :  { %1634 = vpow2.f32 %v1302_v36 }
 0x50e   :  { %v1631_v37 = vpop.eup %1630 }
 0x50f   :  { %509 = vrot.lane.b32.xlu1 %v1631_v37, %s1792_s3  ;;  %v1633_v38 = vpop.eup %1632 }
 0x510   :  { %v1635_v39 = vpop.eup %1634  ;;  %v123_v40 = vadd.f32 1.0, %v1633_v38 }
 0x511   :  { %v124_v41 = vadd.f32 1.0, %v1635_v39 }
 0x512   :  { %1636 = vrcp.f32 %v123_v40 }
 0x513   :  { %1638 = vrcp.f32 %v124_v41 }
 0x51c   :  { %v1637_v42 = vpop.eup %1636 }
 0x51d   :  { %v1639_v43 = vpop.eup %1638  ;;  %v147_v44 = vsel %vm96_vm1, %v88_v32, %v1637_v42 }
 0x51e   :  { %1405 = vmatprep.mubr.msk.f32.mxu0 %vm163_vm2, %v147_v44  ;;  %v148_v45 = vsel %vm96_vm1, %v89_v33, %v1639_v43 }
 0x51f   :  { %1406 = vmatmul.mubr.msk.f32.gmra.mrb[2].mxu0 %vm163_vm2, %v148_v45 }
 0x520   :  { %1444 = vmatprep.mubr.msk.f32.mxu0 %vm1790_vm3, %v1788_v0 }
 0x581   :  { %v510_v47 = vpop.permute.xlu1 %509 }
 0x582   :  { %v512_v48 = vmul.f32 %v510_v47, %v495_v25 }
 0x584   :  { %514 = vrot.lane.b32.xlu0 %v512_v48, %s1793_s22 }
 0x5f2   :  { %v1407_v49 = vpop.f32.mrb[2].mxu0 }
 0x5f3   :  { %v264_v50 = vpop.f32.mrb[3].mxu0  ;;  %v270_v12 = vadd.f32 %v1407_v49, %v1970_v54  ;;  %v280_v49 = vadd.f32 %v1961_v51, %v1970_v54 }
 0x5f4   :  { %v265_v31 = vadd.f32 %v1970_v54, %v264_v50 }
 0x5f6   :  { %v515_v53 = vpop.permute.xlu0 %514 }
 0x5f7   :  { %517 = vst.msk [vmem:[#allocation4 + $0x8] sm:$0xff] %vm83_vm0, %v515_v53  ;;  %1445 = vmatmul.mubr.msk.f32.vlgmr.msra.gmra.mrb[4].mxu0 %vm83_vm0, %v515_v53 }
 0x5f8   :  { %1552 = vmatpush3.bf16.msra.mxu0 %v1920_v35  ;;  %1466 = vmatprep.mubr.msk.f32.mxu0 %vm1790_vm3, %v1788_v0 }
 0x5f9   :  { %1553 = vmatprep.subr.bf16.mxu0 %v1789_v17 }
 0x5fc   :  { %1555 = vmatpush3.bf16.msra.mxu0 %v1934_v46 }
 0x5fd   :  { %1562 = vmatprep.subr.bf16.mxu0 %v1789_v17 }
 0x6ca   :  { %v587_v56 = vpop.f32.mrb[4].mxu0 }
 0x6cb   :  { %v591_v57 = vadd.f32 %v587_v56, %v265_v31  ;;  %v1446_v59 = vpop.f32.mrb[5].mxu0 }
 0x6cd   :  { %v592_v61 = vmul.f32 %v591_v57, %v1977_v60 }
 0x6cf   :  { %1640 = vtanh.f32 %v592_v61 }
 0x6d9   :  { %v1641_v62 = vpop.eup %1640 }
 0x6da   :  { %v594_v63 = vmul.f32 %v1641_v62, %v1977_v60  ;;  %v1132_v62 = vld [vmem:[#allocation12] sm:$0xff] }
 0x6dc   :  { %v595_v1 = vadd.f32 %v594_v63, %v1980_v3  ;;  %v1133_v63 = vld [vmem:[#allocation12 + $0x8] sm:$0xff] }
 0x6de   :  { %598 = vrot.lane.b32.xlu1 %v595_v1, %s1792_s3  ;;  %v596_v5 = vmul.f32 %v595_v1, %v506_v30  ;;  %v275_v30 = vadd.f32 %v1970_v54, %v1963_v52 }
 0x750   :  { %v599_v2 = vpop.permute.xlu1 %598 }
 0x751   :  { %v601_v4 = vmul.f32 %v599_v2, %v595_v1 }
 0x753   :  { %603 = vrot.lane.b32.xlu0 %v601_v4, %s1793_s22 }
 0x7c5   :  { %v604_v6 = vpop.permute.xlu0 %603 }
 0x7c6   :  { %v606_v7 = vadd.f32 %v604_v6, %v596_v5  ;;  %v1134_v6 = vld [vmem:[#allocation12 + $0x10] sm:$0xff] }
 0x7c8   :  { %1642 = vtanh.f32 %v606_v7 }
 0x7d2   :  { %v1643_v8 = vpop.eup %1642 }
 0x7d3   :  { %609 = vrot.lane.b32.xlu1 %v1643_v8, %s1792_s3 }
 0x845   :  { %v610_v9 = vpop.permute.xlu1 %609 }
 0x846   :  { %v612_v10 = vmul.f32 %v610_v9, %v595_v1  ;;  %v1574_v1 = vpack.c.bf16 %v1133_v63, %v1132_v62 }
 0x848   :  { %614 = vrot.lane.b32.xlu0 %v612_v10, %s1793_s22  ;;  %v1124_v10 = vld [vmem:[#allocation4] sm:$0xff] }
 0x8ba   :  { %v615_v11 = vpop.permute.xlu0 %614 }
 0x8bb   :  { %617 = vst.msk [vmem:[#allocation4 + $0x10] sm:$0xff] %vm83_vm0, %v615_v11  ;;  %1456 = vmatmul.mubr.msk.f32.vlgmr.msra.gmra.mrb[8].mxu1 %vm83_vm0, %v615_v11  ;;  %v1125_v11 = vld [vmem:[#allocation4 + $0x8] sm:$0xff] }
 0x8bc   :  { %1558 = vmatpush3.bf16.msra.mxu1 %v1920_v35  ;;  %1477 = vmatprep.mubr.msk.f32.mxu1 %vm1790_vm3, %v1788_v0 }
 0x8bd   :  { %1559 = vmatprep.subr.bf16.mxu1 %v1789_v17 }
 0x8c0   :  { %1561 = vmatpush3.bf16.msra.mxu1 %v1934_v46 }
 0x8c1   :  { %1568 = vmatprep.subr.bf16.mxu1 %v1789_v17 }
 0x98e   :  { %v687_v13 = vpop.f32.mrb[8].mxu1 }
 0x98f   :  { %v691_v14 = vadd.f32 %v687_v13, %v270_v12  ;;  %v1457_v15 = vpop.f32.mrb[9].mxu1  ;;  %v1126_v12 = vld [vmem:[#allocation4 + $0x10] sm:$0xff] }
 0x991   :  { %v692_v16 = vmul.f32 %v691_v14, %v1977_v60 }
 0x993   :  { %1644 = vtanh.f32 %v692_v16  ;;  %v285_v16 = vadd.f32 %v1970_v54, %v1975_v58 }
 0x99d   :  { %v1645_v18 = vpop.eup %1644 }
 0x99e   :  { %v694_v19 = vmul.f32 %v1645_v18, %v1977_v60 }
 0x9a0   :  { %v695_v20 = vadd.f32 %v694_v19, %v1980_v3 }
 0x9a2   :  { %698 = vrot.lane.b32.xlu1 %v695_v20, %s1792_s3  ;;  %v696_v23 = vmul.f32 %v695_v20, %v606_v7  ;;  %v1135_v7 = vld [vmem:[#allocation12 + $0x18] sm:$0xff] }
 0x9a3   :  { %v1578_v8 = vpack.c.bf16 %v1135_v7, %v1134_v6 }
 0xa14   :  { %v699_v21 = vpop.permute.xlu1 %698 }
 0xa15   :  { %v701_v22 = vmul.f32 %v699_v21, %v695_v20 }
 0xa17   :  { %703 = vrot.lane.b32.xlu0 %v701_v22, %s1793_s22  ;;  %v2094_v22 = vld [vmem:[%s2147_s5] ss:$0 sm:$0xff]  ;;  %s1794_s5 = smov 96  }
 0xa89   :  { %v704_v24 = vpop.permute.xlu0 %703 }
 0xa8a   :  { %v706_v25 = vadd.f32 %v704_v24, %v696_v23 }
 0xa8c   :  { %1646 = vtanh.f32 %v706_v25 }
 0xa96   :  { %v1647_v26 = vpop.eup %1646 }
 0xa97   :  { %709 = vrot.lane.b32.xlu1 %v1647_v26, %s1792_s3 }
 0xb09   :  { %v710_v27 = vpop.permute.xlu1 %709 }
 0xb0a   :  { %v712_v28 = vmul.f32 %v710_v27, %v695_v20 }
 0xb0c   :  { %714 = vrot.lane.b32.xlu0 %v712_v28, %s1793_s22 }
 0xb7e   :  { %v715_v29 = vpop.permute.xlu0 %714 }
 0xb7f   :  { %717 = vst.msk [vmem:[#allocation4 + $0x18] sm:$0xff] %vm83_vm0, %v715_v29  ;;  %1467 = vmatmul.mubr.msk.f32.vlgmr.msra.gmra.mrb[6].mxu0 %vm83_vm0, %v715_v29 }
 0xb80   :  { %1564 = vmatpush3.bf16.msra.mxu0 %v1920_v35  ;;  %1488 = vmatprep.mubr.msk.f32.mxu0 %vm1790_vm3, %v1788_v0 }
 0xb81   :  { %1565 = vmatprep.subr.bf16.mxu0 %v1789_v17 }
 0xb84   :  { %1567 = vmatpush3.bf16.msra.mxu0 %v1934_v46 }
 0xb85   :  { %1575 = vmatprep.subr.bf16.mxu0 %v1574_v1 }
 0xb86   :  { %v1127_v13 = vld [vmem:[#allocation4 + $0x18] sm:$0xff] }
 0xc52   :  { %v787_v32 = vpop.f32.mrb[6].mxu0 }
 0xc53   :  { %v791_v33 = vadd.f32 %v787_v32, %v275_v30  ;;  %v1468_v34 = vpop.f32.mrb[7].mxu0 }
 0xc55   :  { %v792_v36 = vmul.f32 %v791_v33, %v1977_v60 }
 0xc57   :  { %1648 = vtanh.f32 %v792_v36 }
 0xc61   :  { %v1649_v37 = vpop.eup %1648 }
 0xc62   :  { %v794_v38 = vmul.f32 %v1649_v37, %v1977_v60 }
 0xc64   :  { %v795_v39 = vadd.f32 %v794_v38, %v1980_v3 }
 0xc66   :  { %798 = vrot.lane.b32.xlu1 %v795_v39, %s1792_s3  ;;  %v796_v42 = vmul.f32 %v795_v39, %v706_v25 }
 0xcd8   :  { %v799_v40 = vpop.permute.xlu1 %798 }
 0xcd9   :  { %v801_v41 = vmul.f32 %v799_v40, %v795_v39 }
 0xcdb   :  { %803 = vrot.lane.b32.xlu0 %v801_v41, %s1793_s22 }
 0xd4d   :  { %v804_v43 = vpop.permute.xlu0 %803 }
 0xd4e   :  { %v806_v52 = vadd.f32 %v804_v43, %v796_v42 }
 0xd50   :  { %1650 = vtanh.f32 %v806_v52 }
 0xd5a   :  { %v1651_v44 = vpop.eup %1650 }
 0xd5b   :  { %809 = vrot.lane.b32.xlu1 %v1651_v44, %s1792_s3 }
 0xdcd   :  { %v810_v45 = vpop.permute.xlu1 %809 }
 0xdce   :  { %v812_v47 = vmul.f32 %v810_v45, %v795_v39 }
 0xdd0   :  { %814 = vrot.lane.b32.xlu0 %v812_v47, %s1793_s22 }
 0xe42   :  { %v815_v48 = vpop.permute.xlu0 %814 }
 0xe43   :  { %817 = vst.msk [vmem:[#allocation4 + $0x20] sm:$0xff] %vm83_vm0, %v815_v48  ;;  %1478 = vmatmul.mubr.msk.f32.vlgmr.msra.gmra.mrb[10].mxu1 %vm83_vm0, %v815_v48 }
 0xe44   :  { %1570 = vmatpush3.bf16.msra.mxu1 %v1920_v35  ;;  %1499 = vmatprep.mubr.msk.f32.mxu1 %vm1790_vm3, %v1788_v0 }
 0xe45   :  { %1571 = vmatprep.subr.bf16.mxu1 %v1789_v17 }
 0xe48   :  { %1573 = vmatpush3.bf16.msra.mxu1 %v1934_v46 }
 0xe4a   :  { %v1128_v14 = vld [vmem:[#allocation4 + $0x20] sm:$0xff] }
 0xf16   :  { %v887_v50 = vpop.f32.mrb[10].mxu1 }
 0xf17   :  { %v891_v53 = vadd.f32 %v887_v50, %v280_v49  ;;  %v1479_v31 = vpop.f32.mrb[11].mxu1  ;;  %v290_v49 = vadd.f32 %v1972_v55, %v1970_v54 }
 0xf19   :  { %v892_v56 = vmul.f32 %v891_v53, %v1977_v60 }
 0xf1b   :  { %1652 = vtanh.f32 %v892_v56 }
 0xf25   :  { %v1653_v57 = vpop.eup %1652 }
 0xf26   :  { %v894_v59 = vmul.f32 %v1653_v57, %v1977_v60 }
 0xf28   :  { %v895_v35 = vadd.f32 %v894_v59, %v1980_v3 }
 0xf2a   :  { %898 = vrot.lane.b32.xlu1 %v895_v35, %s1792_s3  ;;  %v896_v46 = vmul.f32 %v895_v35, %v806_v52 }
 0xf9c   :  { %v899_v0 = vpop.permute.xlu1 %898 }
 0xf9d   :  { %v901_v17 = vmul.f32 %v899_v0, %v895_v35 }
 0xf9f   :  { %903 = vrot.lane.b32.xlu0 %v901_v17, %s1793_s22 }
0x1011   :  { %v904_v61 = vpop.permute.xlu0 %903 }
0x1012   :  { %v2075_v51 = vadd.f32 %v904_v61, %v896_v46 }
0x1014   :  { %1654 = vtanh.f32 %v2075_v51 }
0x101e   :  { %v1655_v2 = vpop.eup %1654 }
0x101f   :  { %909 = vrot.lane.b32.xlu1 %v1655_v2, %s1792_s3 }
0x1091   :  { %v910_v4 = vpop.permute.xlu1 %909 }
0x1092   :  { %v912_v5 = vmul.f32 %v910_v4, %v895_v35 }
0x1094   :  { %914 = vrot.lane.b32.xlu0 %v912_v5, %s1793_s22 }
0x1106   :  { %v915_v9 = vpop.permute.xlu0 %914 }
0x1107   :  { %917 = vst.msk [vmem:[#allocation4 + $0x28] sm:$0xff] %vm83_vm0, %v915_v9  ;;  %1489 = vmatmul.mubr.msk.f32.vlgmr.msra.gmra.mrb[8].mxu0 %vm83_vm0, %v915_v9 }
0x1108   :  { %1577 = vmatpush3.bf16.msra.mxu0 %v1574_v1  ;;  %1510 = vmatprep.mubr.msk.f32.mxu0 %vm83_vm0, %v1124_v10 }
0x1109   :  { %1579 = vmatprep.subr.bf16.mxu0 %v1578_v8 }
0x110c   :  { %1581 = vmatpush3.bf16.msra.mxu0 %v1578_v8 }
0x110e   :  { %v1129_v15 = vld [vmem:[#allocation4 + $0x28] sm:$0xff] }
0x110f   :  { %1511 = vmatmul.mubr.msk.f32.vlgmr.msra.gmra.mrb[10].mxu0 %vm83_vm0, %v1125_v11 }
0x1110   :  { %1513 = vmatprep.mubr.msk.f32.mxu0 %vm83_vm0, %v1126_v12 }
0x1113   :  { %1514 = vmatmul.mubr.msk.f32.gmra.mrb[12].mxu0 %vm83_vm0, %v1127_v13 }
0x1114   :  { %1516 = vmatprep.mubr.msk.f32.mxu0 %vm83_vm0, %v1128_v14 }
0x1117   :  { %1517 = vmatmul.mubr.msk.f32.gmra.mrb[14].mxu0 %vm83_vm0, %v1129_v15 }
0x11da   :  { %v987_v18 = vpop.f32.mrb[8].mxu0 }
0x11db   :  { %v991_v19 = vadd.f32 %v987_v18, %v285_v16  ;;  %v1490_v20 = vpop.f32.mrb[9].mxu0 }
0x11dd   :  { %v992_v21 = vmul.f32 %v991_v19, %v1977_v60 }
0x11df   :  { %1656 = vtanh.f32 %v992_v21 }
0x11e2   :  { %v1512_v23 = vpop.f32.mrb[10].mxu0 }
0x11e3   :  { %v1239_v24 = vadd.f32 %v1512_v23, %v2094_v22  ;;  %v1233_v25 = vpop.f32.mrb[11].mxu0 }
0x11e4   :  { %v1234_v26 = vadd.f32 %v2094_v22, %v1233_v25 }
0x11e5   :  { %1273 = vst [vmem:[#allocation14 + $0x8] sm:$0xff] %v1239_v24 }
0x11e6   :  { %1272 = vst [vmem:[#allocation14] sm:$0xff] %v1234_v26  ;;  %v1515_v58 = vpop.f32.mrb[12].mxu0 }
0x11e7   :  { %v1249_v27 = vadd.f32 %v1515_v58, %v2094_v22  ;;  %v1243_v28 = vpop.f32.mrb[13].mxu0 }
0x11e8   :  { %v1244_v29 = vadd.f32 %v2094_v22, %v1243_v28 }
0x11e9   :  { %v1657_v30 = vpop.eup %1656  ;;  %1275 = vst [vmem:[#allocation14 + $0x18] sm:$0xff] %v1249_v27 }
0x11ea   :  { %1274 = vst [vmem:[#allocation14 + $0x10] sm:$0xff] %v1244_v29  ;;  %v1518_v32 = vpop.f32.mrb[14].mxu0  ;;  %v994_v33 = vmul.f32 %v1657_v30, %v1977_v60 }
0x11eb   :  { %v1259_v34 = vadd.f32 %v1518_v32, %v2094_v22  ;;  %v1253_v36 = vpop.f32.mrb[15].mxu0 }
0x11ec   :  { %v1254_v37 = vadd.f32 %v2094_v22, %v1253_v36  ;;  %v995_v38 = vadd.f32 %v994_v33, %v1980_v3 }
0x11ed   :  { %1277 = vst [vmem:[#allocation14 + $0x28] sm:$0xff] %v1259_v34 }
0x11ee   :  { %1276 = vst [vmem:[#allocation14 + $0x20] sm:$0xff] %v1254_v37  ;;  %998 = vrot.lane.b32.xlu1 %v995_v38, %s1792_s3  ;;  %v996_v41 = vmul.f32 %v995_v38, %v2075_v51 }
0x1260   :  { %v999_v39 = vpop.permute.xlu1 %998 }
0x1261   :  { %v1001_v40 = vmul.f32 %v999_v39, %v995_v38 }
0x1263   :  { %1003 = vrot.lane.b32.xlu0 %v1001_v40, %s1793_s22 }
0x12d5   :  { %v1004_v42 = vpop.permute.xlu0 %1003 }
0x12d6   :  { %v1006_v43 = vadd.f32 %v1004_v42, %v996_v41 }
0x12d8   :  { %1658 = vtanh.f32 %v1006_v43 }
0x12e2   :  { %v1659_v52 = vpop.eup %1658 }
0x12e3   :  { %1009 = vrot.lane.b32.xlu1 %v1659_v52, %s1792_s3 }
0x1355   :  { %v1010_v44 = vpop.permute.xlu1 %1009 }
0x1356   :  { %v1012_v45 = vmul.f32 %v1010_v44, %v995_v38 }
0x1358   :  { %1014 = vrot.lane.b32.xlu0 %v1012_v45, %s1793_s22 }
0x13ca   :  { %v1015_v47 = vpop.permute.xlu0 %1014 }
0x13cb   :  { %1017 = vst.msk [vmem:[#allocation4 + $0x30] sm:$0xff] %vm83_vm0, %v1015_v47  ;;  %1500 = vmatmul.mubr.msk.f32.vlgmr.msra.gmra.mrb[12].mxu1 %vm83_vm0, %v1015_v47 }
0x13d2   :  { %v1130_v48 = vld [vmem:[#allocation4 + $0x30] sm:$0xff] }
0x13d3   :  { %1519 = vmatprep.mubr.msk.f32.mxu0 %vm83_vm0, %v1130_v48 }
0x149e   :  { %v1087_v50 = vpop.f32.mrb[12].mxu1 }
0x149f   :  { %v1091_v53 = vadd.f32 %v1087_v50, %v290_v49  ;;  %v1501_v31 = vpop.f32.mrb[13].mxu1 }
0x14a1   :  { %v1092_v56 = vmul.f32 %v1091_v53, %v1977_v60 }
0x14a3   :  { %1660 = vtanh.f32 %v1092_v56 }
0x14ad   :  { %v1661_v57 = vpop.eup %1660 }
0x14ae   :  { %v1094_v59 = vmul.f32 %v1661_v57, %v1977_v60 }
0x14b0   :  { %v1095_v35 = vadd.f32 %v1094_v59, %v1980_v3 }
0x14b2   :  { %1098 = vrot.lane.b32.xlu1 %v1095_v35, %s1792_s3  ;;  %v1096_v46 = vmul.f32 %v1095_v35, %v1006_v43 }
0x1524   :  { %v1099_v0 = vpop.permute.xlu1 %1098 }
0x1525   :  { %v1101_v17 = vmul.f32 %v1099_v0, %v1095_v35 }
0x1527   :  { %1103 = vrot.lane.b32.xlu0 %v1101_v17, %s1793_s22 }
0x1599   :  { %v1104_v61 = vpop.permute.xlu0 %1103 }
0x159a   :  { %v1106_v54 = vadd.f32 %v1104_v61, %v1096_v46 }
0x159c   :  { %1662 = vtanh.f32 %v1106_v54 }
0x15a6   :  { %v1663_v55 = vpop.eup %1662 }
0x15a7   :  { %1109 = vrot.lane.b32.xlu1 %v1663_v55, %s1792_s3 }
0x15ab   :  { %1120 = vrot.lane.b32.xlu1 %v1106_v54, %s1794_s5 }
0x1619   :  { %v1110_v51 = vpop.permute.xlu1 %1109 }
0x161a   :  { %v1112_v62 = vmul.f32 %v1110_v51, %v1095_v35 }
0x161c   :  { %1114 = vrot.lane.b32.xlu0 %v1112_v62, %s1793_s22 }
0x161d   :  { %v1121_v60 = vpop.permute.xlu1 %1120 }
0x161e   :  { %1123 = vst.msk [vmem:[#allocation3] sm:$0xff] %vm83_vm0, %v1121_v60 }
0x168e   :  { %v1115_v3 = vpop.permute.xlu0 %1114 }
0x168f   :  { %1117 = vst.msk [vmem:[#allocation4 + $0x38] sm:$0xff] %vm83_vm0, %v1115_v3  ;;  %1118 = vst.msk [vmem:[#allocation2] sm:$0xff] %vm83_vm0, %v1115_v3 }
0x1696   :  { %v1131_v63 = vld [vmem:[#allocation4 + $0x38] sm:$0xff] }
0x1697   :  { %1520 = vmatmul.mubr.msk.f32.gmra.mrb[16].mxu0 %vm83_vm0, %v1131_v63 }
0x176a   :  { %v1521_v1 = vpop.f32.mrb[16].mxu0 }
0x176b   :  { %v1269_v2 = vadd.f32 %v1521_v1, %v2094_v22  ;;  %v1263_v4 = vpop.f32.mrb[17].mxu0 }
0x176c   :  { %v1264_v5 = vadd.f32 %v2094_v22, %v1263_v4 }
0x176d   :  { %1279 = vst [vmem:[#allocation14 + $0x38] sm:$0xff] %v1269_v2 }
0x176e   :  { %1278 = vst [vmem:[#allocation14 + $0x30] sm:$0xff] %v1264_v5 }
0x176f   :  { %1763 = shalt.err (!%p1760_p8)
}
0x1770   :  { %s1764_s7 = scalar_lea.hbm %s2148_s6, 1024 }
0x1771   :  { %p1765_p9 = scmp.ne.s32.totalorder %s2148_s6, %s1764_s7  ;;  %p1768_p10 = scmp.lt.u32.totalorder %s1764_s7, %s2148_s6 }
0x1773   :  { %p1770_p11 = pnand %p1768_p10, %p1765_p9 }
0x1775   :  { %1773 = shalt.err (!%p1770_p11)
}
0x1776   :  { %1291 = dma.vmem_to_hbm [thread:$0]  %s1286_s27, 1024, %s2148_s6, [#allocation8], %s1784_s9, %s1784_s9, %s1785_s10  }
0x1777   :  { %1780 = dma.done.wait [#allocation8], 1024  }
0x1778   :  { %1781 = vsyncadd [#allocation8], 4294966272 }
0x1779   :  { %1295 = vsyncpa [#allocation7], 1 }
0x177a   :  { %1296 = vsyncpa [#allocation10], 1 }
0x177b   :  { %1297 = vsyncpa [#allocation13], 1 }
0x177c   :  { %1298 = vsyncpa [#allocation8], 1 }

</bundles_post_ra>
